<compile_context>
chip_gen: v5e
topology: v5e:2x2
jax: 0.10.0
libtpu: 0.0.40
codegen_flags: <defaults>
</compile_context>

<pallas_src>
import functools

import jax
import jax.numpy as jnp
from jax import lax
from jax.experimental import pallas as pl
from jax.experimental.pallas import tpu as pltpu

EPS = 1e-5
_MIB = 1024 * 1024


def _round_up(x, m):
    return (x + m - 1) // m * m


def _cdiv(a, b):
    return (a + b - 1) // b


def _vmem_capacity_bytes():
    # Per-TensorCore VMEM; fall back to the smallest generation (v7x: 64 MiB).
    try:
        return int(pltpu.get_tpu_info().vmem_capacity_bytes)
    except Exception:
        return 64 * _MIB


_VMEM_CAP = _vmem_capacity_bytes()


def _linear_ln_kernel(x_ref, w_ref, g_ref, b_ref, mask_ref, o_ref, *scratch,
                      out_features, out_padded, n_k):
    # f32 accumulator: a VMEM scratch when the output dtype is narrower than f32
    # (and K is tiled), otherwise the resident output block itself.
    acc_ref = scratch[0] if scratch else o_ref

    def epilogue(y):
        inv_n = jnp.float32(1.0 / out_features)
        # Padded W columns are exact zeros, so the row sum needs no masking.
        mean = jnp.sum(y, axis=-1, keepdims=True) * inv_n
        c = y - mean
        if out_padded > out_features:          # static branch
            c = c * mask_ref[...]              # zero padded lanes (single vmul)
        var = jnp.sum(c * c, axis=-1, keepdims=True) * inv_n
        inv = lax.rsqrt(var + EPS)
        o_ref[...] = (c * inv * g_ref[...] + b_ref[...]).astype(o_ref.dtype)

    if n_k == 1:
        # Single K step: no accumulator round-trip at all.
        epilogue(jnp.dot(x_ref[...], w_ref[...],
                         preferred_element_type=jnp.float32))
    else:
        k = pl.program_id(1)

        @pl.when(k == 0)
        def _():
            acc_ref[...] = jnp.zeros_like(acc_ref)

        acc_ref[...] += jnp.dot(x_ref[...], w_ref[...],
                                preferred_element_type=jnp.float32)

        @pl.when(k == n_k - 1)
        def _():
            epilogue(acc_ref[...])


@functools.partial(
    jax.jit,
    static_argnames=("block_rows", "block_k", "mxu_dtype", "w_resident_bytes"))
def linear_layer_norm(x, w, gamma, beta, *, block_rows=512, block_k=1024,
                      mxu_dtype=jnp.bfloat16, w_resident_bytes=None):
    """LayerNorm(x @ w).  x: [..., in_features]; w: [in_features, out_features].

    mxu_dtype: dtype fed to the MXU (default bf16; accumulation and LayerNorm math
      are always f32).  Pass None to keep the original operand dtype.
      # TODO(synk): fp8 W (per-channel scales folded into gamma) would double the
      # v7x MXU rate; needs accuracy validation, so not enabled here.
    w_resident_bytes: if the (double-buffered) weight fits this budget, a single K
      step is used so W is DMA'd from HBM exactly once for the whole grid.
    """
    in_features = x.shape[-1]
    out_features = w.shape[-1]
    lead_shape = x.shape[:-1]
    out_dtype = x.dtype

    if mxu_dtype is not None:
        x = x.astype(mxu_dtype)
        w = w.astype(mxu_dtype)
    op_size = jnp.dtype(x.dtype).itemsize
    out_size = jnp.dtype(out_dtype).itemsize

    x2 = x.reshape(-1, in_features)
    n_rows = x2.shape[0]

    # ---- Lane-dense output: pad out_features to a multiple of 128. ----------
    out_p = _round_up(out_features, 128)

    # ---- K tiling (decides whether W stays VMEM-resident). ------------------
    if w_resident_bytes is None:
        w_resident_bytes = (3 * _VMEM_CAP) // 8          # 24 MiB on v7x, 48 on v6e
    if 2 * in_features * out_p * op_size <= w_resident_bytes:
        # Whole weight fits: single K step, constant W block index => one DMA total.
        # TODO(synk): pipeline_mode=pl.Buffered(1) on the W spec would also drop the
        # unused second buffer; left out for portability across jax versions.
        bk = in_features
    else:
        # Shrink bk so the double-buffered W block fits ~VMEM/4, preferring a bk
        # that divides in_features so x/W need no K padding (no extra HBM pass).
        w_block_budget = _VMEM_CAP // 4
        max_bk = min(block_k, _round_up(in_features, 128))
        while max_bk > 128 and 2 * max_bk * out_p * op_size > w_block_budget:
            max_bk //= 2
        max_bk = max(128, max_bk // 128 * 128)
        bk = None
        for cand in range(max_bk, 127, -128):
            if in_features % cand == 0:
                bk = cand
                break
        if bk is None:
            bk = max_bk                                   # fall back to K padding
    k_pad = _round_up(in_features, bk)
    n_k = k_pad // bk

    use_scratch = (jnp.dtype(out_dtype) != jnp.dtype(jnp.float32)) and n_k > 1

    # ---- Row tiling ----------------------------------------------------------
    sub = max(8, 32 // op_size)                 # sublane tile: 8 f32 / 16 bf16 / 32 8-bit
    bm = min(max(block_rows, sub), _round_up(n_rows, sub))
    # Keep the double-buffered output (+ optional f32 acc scratch) within budget.
    out_row_bytes = out_p * (2 * out_size + (4 if use_scratch else 0))
    out_budget = (3 * _VMEM_CAP) // 10
    while bm > sub and bm * out_row_bytes > out_budget:
        bm = max(sub, _round_up(bm // 2, sub))
    # v7x megacore: give the "parallel" row axis >=2 blocks when there is work.
    if _cdiv(n_rows, bm) < 2 and n_rows >= 4 * sub:
        bm = max(sub, _round_up(_cdiv(n_rows, 2), sub))
    # Keep row padding below ~12.5% of the real rows (no wasted MXU/HBM work).
    while bm > sub and (_round_up(n_rows, bm) - n_rows) * 8 > n_rows:
        bm = max(sub, _round_up(bm // 2, sub))
    n_pad = _round_up(n_rows, bm)

    # ---- Padding (single pad op per array, only when unavoidable). ----------
    if n_pad != n_rows or k_pad != in_features:
        x2 = jnp.pad(x2, ((0, n_pad - n_rows), (0, k_pad - in_features)))
    if k_pad != in_features or out_p != out_features:
        w = jnp.pad(w, ((0, k_pad - in_features), (0, out_p - out_features)))
    if out_p != out_features:
        gamma = jnp.pad(gamma, (0, out_p - out_features))
        beta = jnp.pad(beta, (0, out_p - out_features))
        mask = (lax.broadcasted_iota(jnp.int32, (1, out_p), 1)
                < out_features).astype(jnp.float32)
    else:
        mask = jnp.ones((1, out_p), jnp.float32)

    g2 = gamma.reshape(1, out_p).astype(jnp.float32)
    b2 = beta.reshape(1, out_p).astype(jnp.float32)

    grid = (n_pad // bm, n_k)
    n_row_blocks = n_pad // bm

    # ---- VMEM limit derived from the actual double-buffered footprint. ------
    footprint = (2 * bm * bk * op_size                    # x blocks
                 + 2 * bk * out_p * op_size               # W blocks
                 + 2 * bm * out_p * out_size              # output blocks
                 + (bm * out_p * 4 if use_scratch else 0)  # f32 accumulator
                 + 6 * out_p * 4)                         # gamma / beta / mask
    vmem_limit = max(32 * _MIB,
                     min(footprint + 4 * _MIB, (17 * _VMEM_CAP) // 20))

    w_bytes = k_pad * out_p * op_size
    cost = pl.CostEstimate(
        flops=2 * n_pad * k_pad * out_p + 8 * n_pad * out_p,
        transcendentals=n_pad,                            # one rsqrt per row
        bytes_accessed=(n_pad * k_pad * op_size
                        + (w_bytes if n_k == 1 else n_row_blocks * w_bytes)
                        + n_pad * out_p * out_size
                        + 3 * out_p * 4),
    )

    kernel = functools.partial(_linear_ln_kernel, out_features=out_features,
                               out_padded=out_p, n_k=n_k)
    scratch_shapes = [pltpu.VMEM((bm, out_p), jnp.float32)] if use_scratch else []

    out = pl.pallas_call(
        kernel,
        out_shape=jax.ShapeDtypeStruct((n_pad, out_p), out_dtype),
        grid_spec=pltpu.PrefetchScalarGridSpec(
            num_scalar_prefetch=0,
            grid=grid,
            in_specs=[
                pl.BlockSpec((bm, bk), lambda i, k: (i, k)),
                pl.BlockSpec((bk, out_p), lambda i, k: (k, 0)),
                pl.BlockSpec((1, out_p), lambda i, k: (0, 0)),
                pl.BlockSpec((1, out_p), lambda i, k: (0, 0)),
                pl.BlockSpec((1, out_p), lambda i, k: (0, 0)),
            ],
            out_specs=pl.BlockSpec((bm, out_p), lambda i, k: (i, 0)),
            scratch_shapes=scratch_shapes,
        ),
        compiler_params=pltpu.CompilerParams(
            dimension_semantics=("parallel", "arbitrary"),
            vmem_limit_bytes=vmem_limit,
        ),
        cost_estimate=cost,
    )(x2, w, g2, b2, mask)

    out = out[:n_rows, :out_features]
    return out.reshape(*lead_shape, out_features)


def _reference(x, w, gamma, beta, mxu_dtype=None):
    if mxu_dtype is not None:
        x = x.astype(mxu_dtype)
        w = w.astype(mxu_dtype)
    y = jnp.einsum("...i,io->...o", x.astype(jnp.float32), w.astype(jnp.float32),
                   precision=lax.Precision.HIGHEST)
    mean = jnp.mean(y, axis=-1, keepdims=True)
    var = jnp.mean((y - mean) ** 2, axis=-1, keepdims=True)
    return (y - mean) / jnp.sqrt(var + EPS) * gamma + beta


if __name__ == "__main__":
    key = jax.random.PRNGKey(0)
    k_x, k_w, k_xb, k_wb, k_g, k_b = jax.random.split(key, 6)

    # ---- Test 1: f32 input, default bf16 MXU operands, resident W, no padding.
    batch, seq = 2, 8
    in_features, out_features = 32, 128
    x = jax.random.normal(k_x, (batch, seq, in_features), dtype=jnp.float32)
    bound = 1.0 / jnp.sqrt(jnp.float32(in_features))
    w = jax.random.uniform(k_w, (in_features, out_features), dtype=jnp.float32,
                           minval=-bound, maxval=bound)
    gamma = jnp.ones((out_features,), jnp.float32)   # nn.LayerNorm init
    beta = jnp.zeros((out_features,), jnp.float32)

    out = jax.block_until_ready(linear_layer_norm(x, w, gamma, beta))
    ref = _reference(x, w, gamma, beta, mxu_dtype=jnp.bfloat16)
    assert out.shape == (batch, seq, out_features)
    assert out.dtype == x.dtype
    assert jnp.allclose(out, ref, atol=1e-4, rtol=1e-4), "bf16-MXU path mismatch"

    # f32 MXU operand path.
    out_f32 = jax.block_until_ready(
        linear_layer_norm(x, w, gamma, beta, mxu_dtype=None))
    ref_f32 = _reference(x, w, gamma, beta)
    assert jnp.allclose(out_f32, ref_f32, atol=1e-4, rtol=1e-4), "f32 path mismatch"

    # ---- Test 2: bf16 activations/output, forced K-tiled accumulation, padded
    # out_features (exercises the f32 scratch accumulator and the lane mask).
    in2, out2 = 256, 192
    xb = jax.random.normal(k_xb, (4, 4, in2), dtype=jnp.bfloat16)
    wb = (jax.random.normal(k_wb, (in2, out2), dtype=jnp.float32)
          / jnp.sqrt(jnp.float32(in2))).astype(jnp.bfloat16)
    gb = 1.0 + 0.1 * jax.random.normal(k_g, (out2,), dtype=jnp.float32)
    bb = 0.1 * jax.random.normal(k_b, (out2,), dtype=jnp.float32)

    ob = jax.block_until_ready(
        linear_layer_norm(xb, wb, gb, bb, block_k=128, w_resident_bytes=0))
    rb = _reference(xb, wb, gb, bb, mxu_dtype=jnp.bfloat16)
    assert ob.shape == (4, 4, out2)
    assert ob.dtype == jnp.bfloat16
    assert jnp.allclose(ob.astype(jnp.float32), rb, atol=3e-2, rtol=3e-2), \
        "K-tiled / padded-out path mismatch"

    print("KERNEL_OK")
</pallas_src>

<mosaic_0001>
module attributes {stable_mosaic.version = 11 : i64} {
  func.func @_linear_ln_kernel(%arg0: i32, %arg1: i32, %arg2: memref<16x32xbf16, #tpu.memory_space<vmem>>, %arg3: memref<32x128xbf16, #tpu.memory_space<vmem>>, %arg4: memref<1x128xf32, #tpu.memory_space<vmem>>, %arg5: memref<1x128xf32, #tpu.memory_space<vmem>>, %arg6: memref<1x128xf32, #tpu.memory_space<vmem>>, %arg7: memref<16x128xf32, #tpu.memory_space<vmem>>) attributes {dimension_semantics = [#tpu.dimension_semantics<parallel>, #tpu.dimension_semantics<arbitrary>], iteration_bounds = array<i64: 1, 1>, scalar_prefetch = 0 : i64, scratch_operands = 0 : i64, tpu.core_type = #tpu.core_type<tc>, window_params = [{transform_indices = @transform_0, window_bounds = array<i64: 16, 32>}, {transform_indices = @transform_1, window_bounds = array<i64: 32, 128>}, {pipeline_mode = #tpu.pipeline_mode<synchronous>, transform_indices = @transform_2, window_bounds = array<i64: 1, 128>}, {pipeline_mode = #tpu.pipeline_mode<synchronous>, transform_indices = @transform_3, window_bounds = array<i64: 1, 128>}, {pipeline_mode = #tpu.pipeline_mode<synchronous>, transform_indices = @transform_4, window_bounds = array<i64: 1, 128>}, {transform_indices = @transform_5, window_bounds = array<i64: 16, 128>}]} {
    %c0 = arith.constant 0 : index
    %c0_0 = arith.constant 0 : index
    %0 = vector.load %arg2[%c0, %c0_0] : memref<16x32xbf16, #tpu.memory_space<vmem>>, vector<16x32xbf16>
    %c0_1 = arith.constant 0 : index
    %c0_2 = arith.constant 0 : index
    %1 = vector.load %arg3[%c0_1, %c0_2] : memref<32x128xbf16, #tpu.memory_space<vmem>>, vector<32x128xbf16>
    %cst = arith.constant dense<0.000000e+00> : vector<16x128xf32>
    %2 = tpu.matmul %0, %1, %cst {dimension_numbers = #tpu.dot_dimension_numbers<[1], [0], [0], [1], [0, 0, 1, 1], [], []>} : vector<16x32xbf16>, vector<32x128xbf16>, vector<16x128xf32> -> vector<16x128xf32>
    %cst_3 = arith.constant dense<0.000000e+00> : vector<16xf32>
    %3 = vector.multi_reduction <add>, %2, %cst_3 [1] : vector<16x128xf32> to vector<16xf32>
    %4 = vector.shape_cast %3 : vector<16xf32> to vector<16x1xf32>
    %cst_4 = arith.constant 7.812500e-03 : f32
    %5 = vector.broadcast %cst_4 : f32 to vector<16x1xf32>
    %6 = arith.mulf %4, %5 : vector<16x1xf32>
    %7 = vector.broadcast %6 : vector<16x1xf32> to vector<16x128xf32>
    %8 = arith.subf %2, %7 : vector<16x128xf32>
    %9 = arith.mulf %8, %8 : vector<16x128xf32>
    %cst_5 = arith.constant dense<0.000000e+00> : vector<16xf32>
    %10 = vector.multi_reduction <add>, %9, %cst_5 [1] : vector<16x128xf32> to vector<16xf32>
    %11 = vector.shape_cast %10 : vector<16xf32> to vector<16x1xf32>
    %cst_6 = arith.constant 7.812500e-03 : f32
    %12 = vector.broadcast %cst_6 : f32 to vector<16x1xf32>
    %13 = arith.mulf %11, %12 : vector<16x1xf32>
    %cst_7 = arith.constant 9.99999974E-6 : f32
    %14 = vector.broadcast %cst_7 : f32 to vector<16x1xf32>
    %15 = arith.addf %13, %14 : vector<16x1xf32>
    %16 = math.rsqrt %15 : vector<16x1xf32>
    %17 = vector.broadcast %16 : vector<16x1xf32> to vector<16x128xf32>
    %18 = arith.mulf %8, %17 : vector<16x128xf32>
    %c0_8 = arith.constant 0 : index
    %c0_9 = arith.constant 0 : index
    %19 = vector.load %arg4[%c0_8, %c0_9] : memref<1x128xf32, #tpu.memory_space<vmem>>, vector<1x128xf32>
    %20 = vector.broadcast %19 : vector<1x128xf32> to vector<16x128xf32>
    %21 = arith.mulf %18, %20 : vector<16x128xf32>
    %c0_10 = arith.constant 0 : index
    %c0_11 = arith.constant 0 : index
    %22 = vector.load %arg5[%c0_10, %c0_11] : memref<1x128xf32, #tpu.memory_space<vmem>>, vector<1x128xf32>
    %23 = vector.broadcast %22 : vector<1x128xf32> to vector<16x128xf32>
    %24 = arith.addf %21, %23 : vector<16x128xf32>
    %c0_12 = arith.constant 0 : index
    %c0_13 = arith.constant 0 : index
    %25 = vector.load %arg7[%c0_12, %c0_13] : memref<16x128xf32, #tpu.memory_space<vmem>>, vector<16x128xf32>
    tpu.vector_store %arg7[%c0_12, %c0_13], %24 {strides = array<i32>} : memref<16x128xf32, #tpu.memory_space<vmem>>, vector<16x128xf32>,
    return
  }
  func.func @transform_0(%arg0: i32, %arg1: i32) -> (i32, i32) {
    %c0_i32 = arith.constant 0 : i32
    return %arg0, %arg1 : i32, i32
  }
  func.func @transform_1(%arg0: i32, %arg1: i32) -> (i32, i32) {
    %c0_i32 = arith.constant 0 : i32
    %c0_i32_0 = arith.constant 0 : i32
    return %arg1, %c0_i32 : i32, i32
  }
  func.func @transform_2(%arg0: i32, %arg1: i32) -> (i32, i32) {
    %c0_i32 = arith.constant 0 : i32
    %c0_i32_0 = arith.constant 0 : i32
    %c0_i32_1 = arith.constant 0 : i32
    return %c0_i32, %c0_i32_0 : i32, i32
  }
  func.func @transform_3(%arg0: i32, %arg1: i32) -> (i32, i32) {
    %c0_i32 = arith.constant 0 : i32
    %c0_i32_0 = arith.constant 0 : i32
    %c0_i32_1 = arith.constant 0 : i32
    return %c0_i32, %c0_i32_0 : i32, i32
  }
  func.func @transform_4(%arg0: i32, %arg1: i32) -> (i32, i32) {
    %c0_i32 = arith.constant 0 : i32
    %c0_i32_0 = arith.constant 0 : i32
    %c0_i32_1 = arith.constant 0 : i32
    return %c0_i32, %c0_i32_0 : i32, i32
  }
  func.func @transform_5(%arg0: i32, %arg1: i32) -> (i32, i32) {
    %c0_i32 = arith.constant 0 : i32
    %c0_i32_0 = arith.constant 0 : i32
    return %arg0, %c0_i32 : i32, i32
  }
}

</mosaic_0001>

<bundles_post_ra>
// kernel: linear_layer_norm.1
= control target key start
LH: loop header
LB: loop body
LE: loop exit
PB: predicated region body
PF: predicated region fallthrough
CT: control target
= control target key end

     0   :  { %s237_s0 = inlined_call_operand.vmem [shape: bf16[16,32], index: 0, kind: input, shape index: {}]   ;;  %s238_s1 = inlined_call_operand.vmem [shape: bf16[32,128], index: 1, kind: input, shape index: {}]   ;;  %s239_s2 = inlined_call_operand.vmem [shape: f32[1,128], index: 2, kind: input, shape index: {}]   ;;  %s240_s3 = inlined_call_operand.vmem [shape: f32[1,128], index: 3, kind: input, shape index: {}]   ;;  %s241_s4 = inlined_call_operand.vmem [shape: f32[1,128], index: 4, kind: input, shape index: {}]   ;;  %s242_s5 = inlined_call_operand.hbm [shape: f32[16,128], index: 5, kind: output, shape index: {}]  }
   0x1   :  { %v150_v0 = vld [vmem:[%s238_s1 + $0x8] sm:$0xff] }
   0x2   :  { %10 = vsyncpa [#allocation3], 0  ;;  %55 = vmatpush.bf16.msra.mxu0 %v150_v0  ;;  %v149_v1 = vld [vmem:[%s238_s1] sm:$0xff]  ;;  %vm45_vm0 = vcmask 261120   ;;  %s123_s28 = sshll.u32 %s242_s5, 4  ;;  %s188_s29 = smov 8   ;;  %s124_s28 = int_to_ptr.hbm [resolvable:$true] %s123_s28 }
   0x3   :  { %v148_v2 = vld [vmem:[%s237_s0] sm:$0xff] }
   0x4   :  { %v154_v27 = vld [vmem:[%s239_s2] ss:$0 sm:$0xff]  ;;  %s186_s2 = smov [#allocation2]  }
   0x5   :  { %v155_v31 = vld [vmem:[%s240_s3] ss:$0 sm:$0xff]  ;;  %s121_s25 = sshll.u32 %s186_s2, 4  ;;  %s187_s3 = smov 128   ;;  %s122_s25 = int_to_ptr.vmem [resolvable:$true] %s121_s25 }
   0x6   :  { %56 = vmatpush.bf16.msra.mxu0 %v149_v1 }
   0x9   :  { %147 = vmatmul.msk.bf16.vlgmr.msra.gmra.mxu0 %vm45_vm0, %v148_v2 }
  0x86   :  { %v58_v3 = vpop.f32.mrf.mxu0 }
  0x87   :  { %63 = vadd.xlane.f32.xlu0 %v58_v3 }
  0x8e   :  { %v60_v4 = vpop.f32.mrf.mxu0 }
  0x8f   :  { %65 = vadd.xlane.f32.xlu0 %v60_v4 }
  0xfa   :  { %v64_v5 = vpop.xlane.xlu0 %63 }
  0xfb   :  { %v67_v6 = vmul.f32 0.0078125, %v64_v5 }
  0xfd   :  { %v69_v7 = vsub.f32 %v58_v3, %v67_v6 }
  0xff   :  { %v71_v8 = vmul.f32 %v69_v7, %v69_v7 }
 0x101   :  { %73 = vadd.xlane.f32.xlu1 %v71_v8 }
 0x102   :  { %v66_v9 = vpop.xlane.xlu0 %65 }
 0x103   :  { %v68_v10 = vmul.f32 0.0078125, %v66_v9 }
 0x105   :  { %v70_v11 = vsub.f32 %v60_v4, %v68_v10 }
 0x107   :  { %v72_v12 = vmul.f32 %v70_v11, %v70_v11 }
 0x109   :  { %75 = vadd.xlane.f32.xlu1 %v72_v12 }
 0x174   :  { %v74_v13 = vpop.xlane.xlu1 %73 }
 0x175   :  { %v77_v14 = vmul.f32 0.0078125, %v74_v13 }
 0x177   :  { %v79_v15 = vadd.f32 1e-05, %v77_v14 }
 0x179   :  { %156 = vrsqrt.f32 %v79_v15  ;;  %vm87_vm2 = vweird.f32 %v79_v15 }
 0x17c   :  { %v76_v16 = vpop.xlane.xlu1 %75 }
 0x17d   :  { %v78_v17 = vmul.f32 0.0078125, %v76_v16 }
 0x17f   :  { %v157_v18 = vpop.eup %156  ;;  %v80_v19 = vadd.f32 1e-05, %v78_v17 }
 0x180   :  { %v82_v20 = vmul.f32 %v157_v18, %v79_v15  ;;  %vm88_vm1 = vweird.f32 %v157_v18 }
 0x181   :  { %158 = vrsqrt.f32 %v80_v19  ;;  %vm89_vm3 = vmor %vm87_vm2, %vm88_vm1  ;;  %vm97_vm5 = vweird.f32 %v80_v19 }
 0x182   :  { %v83_v21 = vmul.f32 %v157_v18, %v82_v20 }
 0x184   :  { %v84_v22 = vmul.f32 0.5, %v83_v21 }
 0x186   :  { %v85_v23 = vsub.f32 1.5, %v84_v22 }
 0x187   :  { %v159_v24 = vpop.eup %158 }
 0x188   :  { %v86_v25 = vmul.f32 %v157_v18, %v85_v23  ;;  %v92_v26 = vmul.f32 %v159_v24, %v80_v19  ;;  %vm98_vm4 = vweird.f32 %v159_v24 }
 0x189   :  { %vm99_vm6 = vmor %vm97_vm5, %vm98_vm4 }
 0x18a   :  { %v90_v28 = vsel %vm89_vm3, %v157_v18, %v86_v25  ;;  %v93_v29 = vmul.f32 %v159_v24, %v92_v26 }
 0x18b   :  { %v101_v30 = vmul.f32 %v90_v28, %v69_v7 }
 0x18c   :  { %v94_v32 = vmul.f32 0.5, %v93_v29 }
 0x18d   :  { %v107_v33 = vmul.f32 %v154_v27, %v101_v30 }
 0x18e   :  { %v95_v34 = vsub.f32 1.5, %v94_v32 }
 0x18f   :  { %v113_v35 = vadd.f32 %v155_v31, %v107_v33 }
 0x190   :  { %v96_v36 = vmul.f32 %v159_v24, %v95_v34 }
 0x191   :  { %115 = vst [vmem:[#allocation2] sm:$0xff] %v113_v35 }
 0x192   :  { %v100_v37 = vsel %vm99_vm6, %v159_v24, %v96_v36 }
 0x193   :  { %v102_v38 = vmul.f32 %v100_v37, %v70_v11 }
 0x195   :  { %v108_v39 = vmul.f32 %v154_v27, %v102_v38 }
 0x197   :  { %v114_v40 = vadd.f32 %v155_v31, %v108_v39 }
 0x199   :  { %116 = vst [vmem:[#allocation2 + $0x8] sm:$0xff] %v114_v40 }
 0x19a   :  { %129 = dma.vmem_to_hbm [thread:$0]  %s122_s25, 256, %s124_s28, [#allocation3], %s187_s3, %s187_s3, %s188_s29  }
 0x19b   :  { %184 = dma.done.wait [#allocation3], 256  }
 0x19c   :  { %185 = vsyncadd [#allocation3], 4294967040 }
 0x19d   :  { %134 = vsyncpa [#allocation3], 1 }

</bundles_post_ra>
